<compile_context>
chip_gen: v7x
topology: tpu7x:2x2x1
jax: 0.10.0
libtpu: 0.0.40
codegen_flags: <defaults>
</compile_context>

<pallas_src>
from functools import partial

import numpy as np
import jax
import jax.numpy as jnp
from jax.experimental import pallas as pl
from jax.experimental.pallas import tpu as pltpu

LN_EPS = 1e-5  # PyTorch nn.LayerNorm default


# ----------------------------------------------------------------------------
# In-kernel helpers
# ----------------------------------------------------------------------------
def _layernorm(x, g, b):
    mu = jnp.mean(x, axis=-1, keepdims=True)
    var = jnp.mean((x - mu) ** 2, axis=-1, keepdims=True)
    return (x - mu) * jax.lax.rsqrt(var + LN_EPS) * g + b


# ----------------------------------------------------------------------------
# Generic linear (y = x @ W^T + b) kernel — fc_in / fc_out (row-tiled)
# ----------------------------------------------------------------------------
def linear_kernel(x_ref, wT_ref, b_ref, o_ref):
    x = x_ref[...].astype(jnp.bfloat16)
    o_ref[...] = (
        jnp.dot(x, wT_ref[...], preferred_element_type=jnp.float32) + b_ref[...]
    ).astype(o_ref.dtype)


def linear(x2d, w, b, tm=512):
    """x2d: (M, K) f32; w: (N, K) PyTorch layout; b: (N,) -> (M, N) f32."""
    M, K = x2d.shape
    N = w.shape[0]
    # Lane-dense output: pad N to a multiple of 128 (unmasked stores).
    N_pad = ((N + 127) // 128) * 128
    wT = w.T.astype(jnp.bfloat16)                       # (K, N) bf16 operand
    b2 = b
    if N_pad != N:
        wT = jnp.pad(wT, ((0, 0), (0, N_pad - N)))
        b2 = jnp.pad(b2, (0, N_pad - N))
    tm = M if M <= tm else tm                           # tm=512 amortizes step overhead
    grid = (pl.cdiv(M, tm),)
    out = pl.pallas_call(
        linear_kernel,
        out_shape=jax.ShapeDtypeStruct((M, N_pad), jnp.float32),
        grid=grid,
        in_specs=[pl.BlockSpec((tm, K), lambda i: (i, 0)),
                  pl.BlockSpec((K, N_pad), lambda i: (0, 0)),
                  pl.BlockSpec((1, N_pad), lambda i: (0, 0))],
        out_specs=pl.BlockSpec((tm, N_pad), lambda i: (i, 0)),
        compiler_params=pltpu.CompilerParams(dimension_semantics=("parallel",)),
    )(x2d, wT, b2.reshape(1, N_pad))
    return out[:, :N]


# ----------------------------------------------------------------------------
# Fused transformer stack: grid = (batch_block, layer)
# ----------------------------------------------------------------------------
def vit_blocks_kernel(num_heads,
                      x_ref, mask_ref,
                      g1_ref, be1_ref, wqkvT_ref, bqkv_ref, woT_ref, bo_ref,
                      g2_ref, be2_ref, w1T_ref, b1_ref, gm_ref, bm_ref,
                      w2T_ref, b2_ref,
                      o_ref, attn_ref):
    l = pl.program_id(1)

    # Layer 0: initialize the resident activation block from the input.
    @pl.when(l == 0)
    def _():
        o_ref[...] = x_ref[...]

    Bt, S_pad, H = o_ref.shape
    hd = H // num_heads
    M = Bt * S_pad

    x2 = o_ref[...].reshape(M, H)                  # (Bt*S, H) f32, resident
    neg = mask_ref[...]                            # (1, S_pad) additive key mask

    # ---- self-attention sub-block (pre-LN) ------------------------------
    nx = _layernorm(x2, g1_ref[0], be1_ref[0])
    # Fused QKV projection (scale already folded into Wq/bq).
    qkv = jnp.dot(nx.astype(jnp.bfloat16), wqkvT_ref[0],
                  preferred_element_type=jnp.float32) + bqkv_ref[0]
    qkv = qkv.reshape(Bt, S_pad, 3 * H).astype(jnp.bfloat16)   # single bf16 cast

    # TODO(synk): switch to lax.fori_loop with pl.ds head slices if the
    # per-head (S,S) f32 temporaries cause vreg spills at large S / many heads.
    for h in range(num_heads):
        lo = h * hd
        qh = qkv[:, :, lo:lo + hd]                 # (Bt, S, hd)
        kh = qkv[:, :, H + lo:H + lo + hd]
        vh = qkv[:, :, 2 * H + lo:2 * H + lo + hd]
        # Contract over the last dims -> no explicit kh.T (no XLU transpose).
        s = jnp.einsum('bqd,bkd->bqk', qh, kh,
                       preferred_element_type=jnp.float32) + neg
        s = s - jnp.max(s, axis=-1, keepdims=True)
        p = jnp.exp(s)
        p = p * pl.reciprocal(jnp.sum(p, axis=-1, keepdims=True), approx=True)
        oh = jnp.einsum('bqk,bkd->bqd', p.astype(jnp.bfloat16), vh,
                        preferred_element_type=jnp.float32)
        attn_ref[:, :, lo:lo + hd] = oh.astype(attn_ref.dtype)

    # Single lane-dense Wo matmul after the head loop (Wo un-folded).
    attn2 = attn_ref[...].reshape(M, H)
    attn_out = jnp.dot(attn2, woT_ref[0],
                       preferred_element_type=jnp.float32) + bo_ref[0]
    x2 = x2 + attn_out

    # ---- MLP sub-block ---------------------------------------------------
    nx = _layernorm(x2, g2_ref[0], be2_ref[0])
    h1 = jnp.dot(nx.astype(jnp.bfloat16), w1T_ref[0],
                 preferred_element_type=jnp.float32) + b1_ref[0]
    h1 = _layernorm(h1, gm_ref[0], bm_ref[0])
    h1 = jnp.where(h1 > 0, h1, jnp.expm1(h1))      # ELU(alpha=1)
    h2 = jnp.dot(h1.astype(jnp.bfloat16), w2T_ref[0],
                 preferred_element_type=jnp.float32) + b2_ref[0]

    o_ref[...] = (x2 + h2).reshape(Bt, S_pad, H).astype(o_ref.dtype)


def _stack_block_params(blocks, num_heads):
    """Stack per-layer params on a leading layer axis; pre-transpose weights,
    fold the attention scale into Wq/bq, cast matmul weights to bf16."""
    H = blocks[0]['ln1_g'].shape[0]
    hd = H // num_heads
    scale = 1.0 / float(np.sqrt(hd))

    def per_layer(prm):
        w = prm['in_proj_w']                   # (3H, H): [wq; wk; wv]
        b = prm['in_proj_b']                   # (3H,)
        w = w.at[:H].multiply(scale)
        b = b.at[:H].multiply(scale)
        return dict(
            g1=prm['ln1_g'].reshape(1, H),
            be1=prm['ln1_b'].reshape(1, H),
            wqkvT=w.T.astype(jnp.bfloat16),                 # (H, 3H)
            bqkv=b.reshape(1, 3 * H),
            woT=prm['out_proj_w'].T.astype(jnp.bfloat16),   # (H, H)
            bo=prm['out_proj_b'].reshape(1, H),
            g2=prm['ln2_g'].reshape(1, H),
            be2=prm['ln2_b'].reshape(1, H),
            w1T=prm['mlp_w1'].T.astype(jnp.bfloat16),       # (H, 2H)
            b1=prm['mlp_b1'].reshape(1, 2 * H),
            gm=prm['mlp_ln_g'].reshape(1, 2 * H),
            bm=prm['mlp_ln_b'].reshape(1, 2 * H),
            w2T=prm['mlp_w2'].T.astype(jnp.bfloat16),       # (2H, H)
            b2=prm['mlp_b2'].reshape(1, H),
        )

    per = [per_layer(p) for p in blocks]
    names = ['g1', 'be1', 'wqkvT', 'bqkv', 'woT', 'bo', 'g2', 'be2',
             'w1T', 'b1', 'gm', 'bm', 'w2T', 'b2']
    return [jnp.stack([p[n] for p in per], axis=0) for n in names]


def _per_batch_act_bytes(S_pad, H):
    # f32 activation block in+out (double-buffered), qkv f32, one head's
    # scores+probs f32, mlp hidden f32, bf16 attention scratch.
    return (S_pad * H * 4 * 4 + S_pad * 3 * H * 4 + 2 * S_pad * S_pad * 4
            + S_pad * 2 * H * 4 + S_pad * H * 2)


def _pick_batch_block(B, S_pad, H, max_bt=16, budget_bytes=40 * 1024 * 1024):
    """Largest batch block that keeps double-buffered weights + activations
    within a VMEM budget that is safe even on v7x (64 MiB physical)."""
    w_bytes = 2 * 2 * (3 * H * H + H * H + H * 2 * H + 2 * H * H)  # bf16, x2 buf
    per_b = _per_batch_act_bytes(S_pad, H)
    bt = (budget_bytes - w_bytes) // max(per_b, 1)
    return int(max(1, min(B, min(bt, max_bt))))


def vit_blocks(x, blocks, num_heads, seq_real):
    B, S_pad, H = x.shape
    L = len(blocks)
    stacked = _stack_block_params(blocks, num_heads)

    # Batch blocking: amortize per-layer weight DMA over Bt images.
    Bt = _pick_batch_block(B, S_pad, H)
    B_pad = pl.cdiv(B, Bt) * Bt
    if B_pad != B:
        x = jnp.pad(x, ((0, B_pad - B), (0, 0), (0, 0)))

    # Additive key-padding mask, built once and DMA'd once (constant index_map).
    col = jnp.arange(S_pad, dtype=jnp.int32).reshape(1, S_pad)
    neg_mask = jnp.where(col < seq_real, 0.0, -1e30).astype(jnp.float32)

    x_spec = pl.BlockSpec((Bt, S_pad, H), lambda b, l: (b, 0, 0))
    mask_spec = pl.BlockSpec((1, S_pad), lambda b, l: (0, 0))
    w_specs = [pl.BlockSpec((1,) + tuple(w.shape[1:]), lambda b, l: (l, 0, 0))
               for w in stacked]
    out_spec = pl.BlockSpec((Bt, S_pad, H), lambda b, l: (b, 0, 0))

    # Explicit VMEM budget (weights double-buffered + activation working set),
    # capped so the request is valid on v7x's 64 MiB VMEM.
    w_bytes = 2 * sum(int(np.prod(w.shape[1:])) * w.dtype.itemsize for w in stacked)
    need = w_bytes + Bt * _per_batch_act_bytes(S_pad, H) + (1 << 20)
    vmem_limit = int(min(max(2 * need, 32 * 1024 * 1024), 48 * 1024 * 1024))

    out = pl.pallas_call(
        partial(vit_blocks_kernel, num_heads),
        out_shape=jax.ShapeDtypeStruct((B_pad, S_pad, H), x.dtype),
        grid=(B_pad // Bt, L),
        in_specs=[x_spec, mask_spec] + w_specs,
        out_specs=out_spec,
        scratch_shapes=[pltpu.VMEM((Bt, S_pad, H), jnp.bfloat16)],
        compiler_params=pltpu.CompilerParams(
            dimension_semantics=("parallel", "arbitrary"),
            vmem_limit_bytes=vmem_limit),
    )(x, neg_mask, *stacked)
    return out[:B]


# ----------------------------------------------------------------------------
# ViT forward (glue in plain JAX, compute in Pallas kernels)
# ----------------------------------------------------------------------------
def extract_patches(img, p):
    B, C, H, W = img.shape
    hp, wp = H // p, W // p
    # matches torch unfold(2,p,p).unfold(3,p,p).permute(0,2,3,1,4,5).reshape(...)
    return (img.reshape(B, C, hp, p, wp, p)
               .transpose(0, 2, 4, 1, 3, 5)
               .reshape(B, hp * wp, C * p * p))


def vit_forward(image, params, patch_size, num_heads):
    B = image.shape[0]
    patches = extract_patches(image, patch_size)            # (B, N, C*p*p)
    _, N, Din = patches.shape
    Hd = params['fc_in_w'].shape[0]

    patch_emb = linear(patches.reshape(B * N, Din),
                       params['fc_in_w'], params['fc_in_b']).reshape(B, N, Hd)
    patch_emb = patch_emb + params['pos_embedding']
    out_vec = jnp.broadcast_to(params['out_vec'], (B, 1, Hd))
    embs = jnp.concatenate([out_vec, patch_emb], axis=1)    # (B, S, Hd)

    S = N + 1
    S_pad = ((S + 15) // 16) * 16          # 16-aligned (bf16 sublane packing)
    if S_pad != S:
        embs = jnp.pad(embs, ((0, 0), (0, S_pad - S), (0, 0)))

    embs = vit_blocks(embs, params['blocks'], num_heads, seq_real=S)
    return linear(embs[:, 0], params['fc_out_w'], params['fc_out_b'])


# ----------------------------------------------------------------------------
# Pure-JAX f32 reference (same math, no Pallas) — sanity check
# ----------------------------------------------------------------------------
def _ref_ln(x, g, b):
    mu = x.mean(-1, keepdims=True)
    var = ((x - mu) ** 2).mean(-1, keepdims=True)
    return (x - mu) / jnp.sqrt(var + LN_EPS) * g + b


def _ref_block(x, prm, num_heads):
    B, S, H = x.shape
    hd = H // num_heads
    nx = _ref_ln(x, prm['ln1_g'], prm['ln1_b'])
    qkv = nx @ prm['in_proj_w'].T + prm['in_proj_b']
    q, k, v = jnp.split(qkv, 3, axis=-1)
    q = q.reshape(B, S, num_heads, hd).transpose(0, 2, 1, 3)
    k = k.reshape(B, S, num_heads, hd).transpose(0, 2, 1, 3)
    v = v.reshape(B, S, num_heads, hd).transpose(0, 2, 1, 3)
    s = (q @ jnp.swapaxes(k, -1, -2)) / jnp.sqrt(jnp.float32(hd))
    p = jax.nn.softmax(s, axis=-1)
    o = (p @ v).transpose(0, 2, 1, 3).reshape(B, S, H)
    o = o @ prm['out_proj_w'].T + prm['out_proj_b']
    x = x + o
    nx = _ref_ln(x, prm['ln2_g'], prm['ln2_b'])
    h1 = nx @ prm['mlp_w1'].T + prm['mlp_b1']
    h1 = _ref_ln(h1, prm['mlp_ln_g'], prm['mlp_ln_b'])
    h1 = jnp.where(h1 > 0, h1, jnp.expm1(h1))
    return x + (h1 @ prm['mlp_w2'].T + prm['mlp_b2'])


def ref_forward(image, params, patch_size, num_heads):
    B = image.shape[0]
    patches = extract_patches(image, patch_size)
    emb = patches @ params['fc_in_w'].T + params['fc_in_b'] + params['pos_embedding']
    out_vec = jnp.broadcast_to(params['out_vec'], (B, 1, emb.shape[-1]))
    embs = jnp.concatenate([out_vec, emb], axis=1)
    for blk in params['blocks']:
        embs = _ref_block(embs, blk, num_heads)
    return embs[:, 0] @ params['fc_out_w'].T + params['fc_out_b']


# ----------------------------------------------------------------------------
# Deterministic parameter init (shapes match the PyTorch module)
# ----------------------------------------------------------------------------
def init_params(key, img_size, in_channels, patch_size, hidden, num_layers, num_classes):
    keys = iter(jax.random.split(key, 64))

    def nrm(shape, std=0.05):
        return (std * jax.random.normal(next(keys), shape)).astype(jnp.float32)

    Din = in_channels * patch_size * patch_size
    seq_len = (img_size // patch_size) ** 2
    params = {
        'fc_in_w': nrm((hidden, Din)),
        'fc_in_b': nrm((hidden,)),
        'fc_out_w': nrm((num_classes, hidden)),
        'fc_out_b': nrm((num_classes,)),
        'out_vec': jnp.zeros((1, 1, hidden), jnp.float32),
        'pos_embedding': nrm((1, seq_len, hidden), std=0.001),
        'blocks': [],
    }
    for _ in range(num_layers):
        params['blocks'].append({
            'ln1_g': jnp.ones((hidden,), jnp.float32),
            'ln1_b': jnp.zeros((hidden,), jnp.float32),
            'in_proj_w': nrm((3 * hidden, hidden)),
            'in_proj_b': nrm((3 * hidden,)),
            'out_proj_w': nrm((hidden, hidden)),
            'out_proj_b': nrm((hidden,)),
            'ln2_g': jnp.ones((hidden,), jnp.float32),
            'ln2_b': jnp.zeros((hidden,), jnp.float32),
            'mlp_w1': nrm((2 * hidden, hidden)),
            'mlp_b1': nrm((2 * hidden,)),
            'mlp_ln_g': jnp.ones((2 * hidden,), jnp.float32),
            'mlp_ln_b': jnp.zeros((2 * hidden,), jnp.float32),
            'mlp_w2': nrm((hidden, 2 * hidden)),
            'mlp_b2': nrm((hidden,)),
        })
    return params


# ----------------------------------------------------------------------------
if __name__ == "__main__":
    img_size, in_channels, patch_size = 16, 4, 4
    hidden, num_layers, num_heads, num_classes = 32, 2, 4, 2
    batch = 2

    key = jax.random.PRNGKey(0)
    kp, kx = jax.random.split(key)
    params = init_params(kp, img_size, in_channels, patch_size,
                         hidden, num_layers, num_classes)
    image = jax.random.normal(kx, (batch, in_channels, img_size, img_size),
                              dtype=jnp.float32)

    out = vit_forward(image, params, patch_size, num_heads)
    out = jax.block_until_ready(out)
    assert out.shape == (batch, num_classes)

    # f32 reference; kernel uses bf16 MXU operands -> relaxed tolerance.
    ref = ref_forward(image, params, patch_size, num_heads)
    np.testing.assert_allclose(np.asarray(out), np.asarray(ref),
                               rtol=5e-2, atol=5e-2)
    print("KERNEL_OK")
</pallas_src>

<mosaic_0001>
module attributes {stable_mosaic.version = 11 : i64} {
  func.func @linear_kernel(%arg0: i32, %arg1: memref<32x64xf32, #tpu.memory_space<vmem>>, %arg2: memref<64x128xbf16, #tpu.memory_space<vmem>>, %arg3: memref<1x128xf32, #tpu.memory_space<vmem>>, %arg4: memref<32x128xf32, #tpu.memory_space<vmem>>) attributes {dimension_semantics = [#tpu.dimension_semantics<parallel>], iteration_bounds = array<i64: 1>, scalar_prefetch = 0 : i64, scratch_operands = 0 : i64, tpu.core_type = #tpu.core_type<tc>, window_params = [{transform_indices = @transform_0, window_bounds = array<i64: 32, 64>}, {pipeline_mode = #tpu.pipeline_mode<synchronous>, transform_indices = @transform_1, window_bounds = array<i64: 64, 128>}, {pipeline_mode = #tpu.pipeline_mode<synchronous>, transform_indices = @transform_2, window_bounds = array<i64: 1, 128>}, {transform_indices = @transform_3, window_bounds = array<i64: 32, 128>}]} {
    %c0 = arith.constant 0 : index
    %c0_0 = arith.constant 0 : index
    %0 = vector.load %arg1[%c0, %c0_0] : memref<32x64xf32, #tpu.memory_space<vmem>>, vector<32x64xf32>
    %1 = arith.truncf %0 : vector<32x64xf32> to vector<32x64xbf16>
    %c0_1 = arith.constant 0 : index
    %c0_2 = arith.constant 0 : index
    %2 = vector.load %arg2[%c0_1, %c0_2] : memref<64x128xbf16, #tpu.memory_space<vmem>>, vector<64x128xbf16>
    %cst = arith.constant dense<0.000000e+00> : vector<32x128xf32>
    %3 = tpu.matmul %1, %2, %cst {dimension_numbers = #tpu.dot_dimension_numbers<[1], [0], [0], [1], [0, 0, 1, 1], [], []>} : vector<32x64xbf16>, vector<64x128xbf16>, vector<32x128xf32> -> vector<32x128xf32>
    %c0_3 = arith.constant 0 : index
    %c0_4 = arith.constant 0 : index
    %4 = vector.load %arg3[%c0_3, %c0_4] : memref<1x128xf32, #tpu.memory_space<vmem>>, vector<1x128xf32>
    %5 = vector.broadcast %4 : vector<1x128xf32> to vector<32x128xf32>
    %6 = arith.addf %3, %5 : vector<32x128xf32>
    %c0_5 = arith.constant 0 : index
    %c0_6 = arith.constant 0 : index
    %7 = vector.load %arg4[%c0_5, %c0_6] : memref<32x128xf32, #tpu.memory_space<vmem>>, vector<32x128xf32>
    tpu.vector_store %arg4[%c0_5, %c0_6], %6 {strides = array<i32>} : memref<32x128xf32, #tpu.memory_space<vmem>>, vector<32x128xf32>,
    return
  }
  func.func @transform_0(%arg0: i32) -> (i32, i32) {
    %c0_i32 = arith.constant 0 : i32
    %c0_i32_0 = arith.constant 0 : i32
    return %arg0, %c0_i32 : i32, i32
  }
  func.func @transform_1(%arg0: i32) -> (i32, i32) {
    %c0_i32 = arith.constant 0 : i32
    %c0_i32_0 = arith.constant 0 : i32
    %c0_i32_1 = arith.constant 0 : i32
    return %c0_i32, %c0_i32_0 : i32, i32
  }
  func.func @transform_2(%arg0: i32) -> (i32, i32) {
    %c0_i32 = arith.constant 0 : i32
    %c0_i32_0 = arith.constant 0 : i32
    %c0_i32_1 = arith.constant 0 : i32
    return %c0_i32, %c0_i32_0 : i32, i32
  }
  func.func @transform_3(%arg0: i32) -> (i32, i32) {
    %c0_i32 = arith.constant 0 : i32
    %c0_i32_0 = arith.constant 0 : i32
    return %arg0, %c0_i32 : i32, i32
  }
}

</mosaic_0001>

<bundles_post_ra>
// kernel: tpu_custom_call.1
= control target key start
LH: loop header
LB: loop body
LE: loop exit
PB: predicated region body
PF: predicated region fallthrough
CT: control target
= control target key end

     0   :  { %8 = vsyncpa [#allocation3], 0  ;;  %s347_s0 = inlined_call_operand.hbm [shape: f32[32,64], index: 0, kind: input, shape index: {}]   ;;  %s348_s1 = inlined_call_operand.hbm [shape: bf16[64,128], index: 1, kind: input, shape index: {}]   ;;  %s349_s2 = inlined_call_operand.vmem [shape: f32[1,128], index: 2, kind: input, shape index: {}]   ;;  %s350_s3 = inlined_call_operand.hbm [shape: f32[32,128], index: 3, kind: output, shape index: {}]  }
   0x1   :  { %9 = vsyncpa [#allocation6], 0 }
   0x2   :  { %10 = vsyncpa [#allocation4], 0  ;;  %s275_s12 = smov [#allocation2]   ;;  %s203_s16 = scalar_lea.hbm %s347_s0, 512 }
   0x3   :  { %s16_s13 = sshll.u32 %s275_s12, 4  ;;  %p204_p0 = scmp.ne.s32.totalorder %s347_s0, %s203_s16  ;;  %s17_s13 = int_to_ptr.vmem [resolvable:$true] %s16_s13 }
   0x4   :  { %p207_p1 = scmp.lt.u32.totalorder %s203_s16, %s347_s0 }
   0x6   :  { %p209_p2 = pnand %p207_p1, %p204_p0 }
   0x8   :  { %212 = shalt.err (!%p209_p2)
}
   0x9   :  { %s213_s21 = scalar_lea.vmem %s17_s13, 512  ;;  %p218_p4 = scmp.lt.s32.totalorder %s17_s13, %s17_s13 }
   0xa   :  { %p214_p3 = scmp.ne.s32.totalorder %s17_s13, %s213_s21  ;;  %p219_p5 = scmp.lt.s32.totalorder %s213_s21, %s213_s21 }
   0xc   :  { %p220_p6 = por %p219_p5, %p218_p4 }
   0xe   :  { %p221_p7 = pnand %p220_p6, %p214_p3 }
  0x10   :  { %224 = shalt.err (!%p221_p7)
}
  0x11   :  { %s276_s22 = smov 128   ;;  %s277_s23 = smov 8  }
  0x12   :  { %22 = dma.hbm_to_vmem [thread:$0]  %s347_s0, 512, %s17_s13, [#allocation3], %s276_s22, %s276_s22, %s277_s23  }
  0x13   :  { %s278_s26 = smov [#allocation5]   ;;  %s225_s30 = scalar_lea.hbm %s348_s1, 512 }
  0x14   :  { %s28_s27 = sshll.u32 %s278_s26, 4  ;;  %p226_p8 = scmp.ne.s32.totalorder %s348_s1, %s225_s30  ;;  %s29_s27 = int_to_ptr.vmem [resolvable:$true] %s28_s27 }
  0x15   :  { %p229_p9 = scmp.lt.u32.totalorder %s225_s30, %s348_s1 }
  0x17   :  { %p231_p10 = pnand %p229_p9, %p226_p8 }
  0x19   :  { %234 = shalt.err (!%p231_p10)
}
  0x1a   :  { %s235_s8 = scalar_lea.vmem %s29_s27, 512  ;;  %p240_p12 = scmp.lt.s32.totalorder %s29_s27, %s29_s27 }
  0x1b   :  { %p236_p11 = scmp.ne.s32.totalorder %s29_s27, %s235_s8  ;;  %p241_p13 = scmp.lt.s32.totalorder %s235_s8, %s235_s8 }
  0x1d   :  { %p242_p0 = por %p241_p13, %p240_p12 }
  0x1f   :  { %p243_p1 = pnand %p242_p0, %p236_p11 }
  0x21   :  { %246 = shalt.err (!%p243_p1)
}
  0x22   :  { %s279_s0 = smov 64   ;;  %s280_s9 = smov 4  }
  0x23   :  { %34 = dma.hbm_to_vmem [thread:$0]  %s348_s1, 512, %s29_s27, [#allocation6], %s279_s0, %s279_s0, %s280_s9  }
  0x24   :  { %269 = dma.done.wait [#allocation3], 512  }
  0x25   :  { %270 = vsyncadd [#allocation3], 4294966784 }
  0x26   :  { %271 = dma.done.wait [#allocation6], 512  }
  0x27   :  { %272 = vsyncadd [#allocation6], 4294966784  ;;  %v199_v0 = vld [vmem:[#allocation5] sm:$0xff]   ;;  %v200_v1 = vld [vmem:[#allocation5 + $0x8] sm:$0xff]   ;;  %vm89_vm0 = vcmask 523264   ;;  %s281_s13 = smov [#allocation7]  }
  0x28   :  { %180 = vmatprep.subr.bf16.mxu0 %v199_v0  ;;  %v201_v2 = vld [vmem:[#allocation5 + $0x10] sm:$0xff]   ;;  %v44_v3 = vld [vmem:[#allocation2] sm:$0xff]  ;;  %v45_v4 = vld [vmem:[#allocation2 + $0x8] sm:$0xff]  ;;  %s154_s14 = sshll.u32 %s281_s13, 4  ;;  %s155_s14 = int_to_ptr.vmem [resolvable:$true] %s154_s14 }
  0x29   :  { %181 = vmatpush3.bf16.msra.mxu0 %v199_v0  ;;  %v48_v5 = vpack.c.bf16 %v45_v4, %v44_v3  ;;  %v202_v6 = vld [vmem:[#allocation5 + $0x18] sm:$0xff]   ;;  %v46_v7 = vld [vmem:[#allocation2 + $0x10] sm:$0xff]  ;;  %v167_v10 = vld [vmem:[%s349_s2] ss:$0 sm:$0xff]  ;;  %s247_s15 = scalar_lea.vmem %s155_s14, 512  ;;  %p252_p3 = scmp.lt.s32.totalorder %s155_s14, %s155_s14 }
  0x2a   :  { %182 = vmatprep.subr.bf16.mxu0 %v200_v1  ;;  %v47_v8 = vld [vmem:[#allocation2 + $0x18] sm:$0xff]  ;;  %p248_p2 = scmp.ne.s32.totalorder %s155_s14, %s247_s15  ;;  %p253_p4 = scmp.lt.s32.totalorder %s247_s15, %s247_s15 }
  0x2b   :  { %188 = vmatprep.mubr.msk.bf16.mxu0 %vm89_vm0, %v48_v5  ;;  %v49_v9 = vpack.c.bf16 %v47_v8, %v46_v7 }
  0x2c   :  { %p254_p5 = por %p253_p4, %p252_p3 }
  0x2d   :  { %183 = vmatpush3.bf16.msra.mxu0 %v200_v1 }
  0x2e   :  { %184 = vmatprep.subr.bf16.mxu0 %v201_v2  ;;  %p255_p6 = pnand %p254_p5, %p248_p2 }
  0x31   :  { %185 = vmatpush3.bf16.msra.mxu0 %v201_v2 }
  0x32   :  { %186 = vmatprep.subr.bf16.mxu0 %v202_v6 }
  0x35   :  { %187 = vmatpush3.bf16.msra.mxu0 %v202_v6 }
  0x38   :  { %189 = vmatmul.mubr.msk.bf16.vlgmr.msra.gmra.mrb[0].mxu0 %vm89_vm0, %v49_v9 }
 0x10b   :  { %v190_v11 = vpop.f32.mrb[0].mxu0 }
 0x10c   :  { %v139_v12 = vadd.f32 %v190_v11, %v167_v10  ;;  %v130_v13 = vpop.f32.mrb[1].mxu0 }
 0x10d   :  { %v131_v14 = vadd.f32 %v167_v10, %v130_v13  ;;  %v191_v15 = vpop.f32.mrb[2].mxu0 }
 0x10e   :  { %147 = vst [vmem:[#allocation7 + $0x10] sm:$0xff] %v139_v12  ;;  %v142_v16 = vadd.f32 %v191_v15, %v167_v10  ;;  %v133_v17 = vpop.f32.mrb[3].mxu0 }
 0x10f   :  { %145 = vst [vmem:[#allocation7] sm:$0xff] %v131_v14  ;;  %v134_v18 = vadd.f32 %v167_v10, %v133_v17 }
 0x110   :  { %148 = vst [vmem:[#allocation7 + $0x18] sm:$0xff] %v142_v16 }
 0x111   :  { %146 = vst [vmem:[#allocation7 + $0x8] sm:$0xff] %v134_v18 }
 0x112   :  { %258 = shalt.err (!%p255_p6)
}
 0x113   :  { %s259_s17 = scalar_lea.hbm %s350_s3, 512 }
 0x114   :  { %p260_p7 = scmp.ne.s32.totalorder %s350_s3, %s259_s17  ;;  %p263_p8 = scmp.lt.u32.totalorder %s259_s17, %s350_s3 }
 0x116   :  { %p265_p9 = pnand %p263_p8, %p260_p7 }
 0x118   :  { %268 = shalt.err (!%p265_p9)
}
 0x119   :  { %160 = dma.vmem_to_hbm [thread:$0]  %s155_s14, 512, %s350_s3, [#allocation4], %s276_s22, %s276_s22, %s277_s23  }
 0x11a   :  { %273 = dma.done.wait [#allocation4], 512  }
 0x11b   :  { %274 = vsyncadd [#allocation4], 4294966784 }
 0x11c   :  { %164 = vsyncpa [#allocation3], 1 }
 0x11d   :  { %165 = vsyncpa [#allocation6], 1 }
 0x11e   :  { %166 = vsyncpa [#allocation4], 1 }

</bundles_post_ra>
